<compile_context>
chip_gen: v5e
topology: v5e:2x2
jax: 0.10.0
libtpu: 0.0.40
codegen_flags: <defaults>
</compile_context>

<pallas_src>
import functools

import numpy as np
import jax
import jax.numpy as jnp
from jax.experimental import pallas as pl
from jax.experimental.pallas import tpu as pltpu


def _disblock_kernel(x_ref, w1_ref, w2_ref, wsc_ref, pool_ref, mask_ref,
                     out_ref, *, H, W):
    """B images per grid step.  Activations: (C, B*H*W), spatial+image on lanes."""
    lanes = x_ref.shape[1]
    Cout = wsc_ref.shape[0]

    x = x_ref[...]                                   # (Cin, lanes) f32
    masks = mask_ref[...]                            # (9, lanes)   f32 constants
    ones_row = jnp.ones((1, lanes), jnp.bfloat16)    # cheap splat (bias row)

    shifts = [(dy - 1) * W + (dx - 1) for dy in range(3) for dx in range(3)]

    def im2col_bf16(act):                            # act: (C, lanes) f32
        taps = []
        for t, s in enumerate(shifts):
            if s == 0:
                taps.append(act.astype(jnp.bfloat16))        # center tap
            else:
                rolled = jnp.roll(act, -s, axis=1)           # lane rotation
                taps.append((rolled * masks[t:t + 1, :]).astype(jnp.bfloat16))
        taps.append(ones_row)                                # bias (ones) row
        return jnp.concatenate(taps, axis=0)                 # (9C+1, lanes) bf16

    # ---- residual branch: relu -> c1(+b1) -> relu -> c2(+b2) ----------------
    xr = jnp.maximum(x, 0.0)
    h1 = jnp.dot(w1_ref[...], im2col_bf16(xr),
                 preferred_element_type=jnp.float32)          # (Chid, lanes)
    h1r = jnp.maximum(h1, 0.0)
    h2 = jnp.dot(w2_ref[...], im2col_bf16(h1r),
                 preferred_element_type=jnp.float32)          # (Cout, lanes)

    # ---- merged AvgPool2d(2): pool(h2), pool(x), pool(ones)=ones in one dot --
    stacked = jnp.concatenate(
        [h2.astype(jnp.bfloat16), x.astype(jnp.bfloat16), ones_row], axis=0)
    pooled = jnp.dot(stacked, pool_ref[...],
                     preferred_element_type=jnp.float32)      # (Cout+Cin+1, B*HoWo)

    # ---- shortcut: 1x1 conv (+bias via pooled ones row) on pooled x ----------
    res = pooled[:Cout, :]                                    # pooled residual
    sc = jnp.dot(wsc_ref[...], pooled[Cout:, :].astype(jnp.bfloat16),
                 preferred_element_type=jnp.float32)          # (Cout, B*HoWo)

    out_ref[0] = (res + sc).astype(out_ref.dtype)


def _pick_images_per_step(N):
    # Batch images into lanes, but keep >= 2 grid steps when possible (v7x TCs).
    for cand in (8, 4, 2):
        if N % cand == 0 and N // cand >= 2:
            return cand
    return 1


def disblock_forward(x_nchw, params):
    """x_nchw: (N, Cin, H, W) float32.  Returns (N, Cout, H//2, W//2)."""
    w1, b1, w2, b2, wsc, bsc = params
    N, Cin, H, W = x_nchw.shape
    Chid, Cout = w1.shape[3], w2.shape[3]
    Ho, Wo = H // 2, W // 2
    HW, HoWo = H * W, Ho * Wo

    B = _pick_images_per_step(N)
    S = N // B
    lanes = B * HW

    # Activations: channels on sublanes, (image, spatial) flattened on lanes.
    x_flat = jnp.transpose(x_nchw, (1, 0, 2, 3)).reshape(Cin, N * HW)

    # Conv weights HWIO -> (Cout, 9*Cin [+ bias col]) matching im2col row order
    # k = (dy*3 + dx)*Cin + cin; bias folded as last column.  bf16 MXU operands.
    w1f = jnp.concatenate(
        [jnp.transpose(w1, (3, 0, 1, 2)).reshape(Chid, 9 * Cin),
         b1.reshape(Chid, 1)], axis=1).astype(jnp.bfloat16)
    w2f = jnp.concatenate(
        [jnp.transpose(w2, (3, 0, 1, 2)).reshape(Cout, 9 * Chid),
         b2.reshape(Cout, 1)], axis=1).astype(jnp.bfloat16)
    wsc_aug = jnp.concatenate(
        [jnp.transpose(wsc), bsc.reshape(Cout, 1)], axis=1).astype(jnp.bfloat16)

    # Constant pooling matrix (block-diagonal over B images), built host-side.
    r = np.arange(HW)
    col = (r // W // 2) * Wo + (r % W // 2)
    pool_single = np.zeros((HW, HoWo), np.float32)
    pool_single[r, col] = 0.25
    pool_t = jnp.asarray(
        np.kron(np.eye(B, dtype=np.float32), pool_single)).astype(jnp.bfloat16)

    # Constant boundary masks (zero-padding emulation), tiled over B images.
    py, px = r // W, r % W
    mask_rows = []
    for dy in range(3):
        for dx in range(3):
            oy, ox = dy - 1, dx - 1
            mask_rows.append(((py + oy >= 0) & (py + oy < H) &
                              (px + ox >= 0) & (px + ox < W)).astype(np.float32))
    masks = jnp.asarray(np.tile(np.stack(mask_rows, axis=0), (1, B)))  # (9, lanes)

    kernel = functools.partial(_disblock_kernel, H=H, W=W)

    out = pl.pallas_call(
        kernel,
        out_shape=jax.ShapeDtypeStruct((S, Cout, B * HoWo), jnp.float32),
        grid_spec=pltpu.PrefetchScalarGridSpec(
            num_scalar_prefetch=0,
            grid=(S,),
            in_specs=[
                pl.BlockSpec((Cin, lanes), lambda n: (0, n)),            # x
                pl.BlockSpec((Chid, 9 * Cin + 1), lambda n: (0, 0)),     # w1 (+b1)
                pl.BlockSpec((Cout, 9 * Chid + 1), lambda n: (0, 0)),    # w2 (+b2)
                pl.BlockSpec((Cout, Cin + 1), lambda n: (0, 0)),         # wsc (+bsc)
                pl.BlockSpec((B * HW, B * HoWo), lambda n: (0, 0)),      # pool_t
                pl.BlockSpec((9, lanes), lambda n: (0, 0)),              # masks
            ],
            out_specs=pl.BlockSpec((1, Cout, B * HoWo), lambda n: (n, 0, 0)),
        ),
        compiler_params=pltpu.CompilerParams(dimension_semantics=("parallel",)),
    )(x_flat, w1f, w2f, wsc_aug, pool_t, masks)

    # (S, Cout, B*Ho*Wo) -> (N, Cout, Ho, Wo): free layout plumbing in XLA.
    return (out.reshape(S, Cout, B, Ho, Wo)
               .transpose(0, 2, 1, 3, 4)
               .reshape(N, Cout, Ho, Wo))


# ----------------------------- reference (plain JAX) -------------------------
def _avgpool2(a):
    N, H, W, C = a.shape
    return a.reshape(N, H // 2, 2, W // 2, 2, C).mean(axis=(2, 4))


def disblock_reference(x_nchw, params):
    w1, b1, w2, b2, wsc, bsc = params
    dn = ('NHWC', 'HWIO', 'NHWC')
    relu = lambda a: jnp.maximum(a, 0.0)
    x = jnp.transpose(x_nchw, (0, 2, 3, 1))
    h = relu(x)
    h = jax.lax.conv_general_dilated(h, w1, (1, 1), ((1, 1), (1, 1)),
                                     dimension_numbers=dn) + b1.reshape(1, 1, 1, -1)
    h = relu(h)
    h = jax.lax.conv_general_dilated(h, w2, (1, 1), ((1, 1), (1, 1)),
                                     dimension_numbers=dn) + b2.reshape(1, 1, 1, -1)
    h = _avgpool2(h)
    sc = jax.lax.conv_general_dilated(x, wsc.reshape(1, 1, *wsc.shape), (1, 1),
                                      ((0, 0), (0, 0)),
                                      dimension_numbers=dn) + bsc.reshape(1, 1, 1, -1)
    sc = _avgpool2(sc)
    return jnp.transpose(h + sc, (0, 3, 1, 2))


if __name__ == "__main__":
    N, Cin, H, W = 2, 4, 16, 16
    Chid, Cout = Cin, 8                                 # hidden = in_channels

    key = jax.random.PRNGKey(0)
    kx, kw1, kb1, kw2, kb2, kwsc, kbsc = jax.random.split(key, 7)

    x = jax.random.normal(kx, (N, Cin, H, W), jnp.float32)
    w1 = 0.1 * jax.random.normal(kw1, (3, 3, Cin, Chid), jnp.float32)
    b1 = 0.05 * jax.random.normal(kb1, (1, Chid), jnp.float32)
    w2 = 0.1 * jax.random.normal(kw2, (3, 3, Chid, Cout), jnp.float32)
    b2 = 0.05 * jax.random.normal(kb2, (1, Cout), jnp.float32)
    wsc = 0.1 * jax.random.normal(kwsc, (Cin, Cout), jnp.float32)
    bsc = 0.05 * jax.random.normal(kbsc, (1, Cout), jnp.float32)
    params = (w1, b1, w2, b2, wsc, bsc)

    out = jax.block_until_ready(disblock_forward(x, params))
    ref = jax.block_until_ready(disblock_reference(x, params))

    # bf16 MXU operands (f32 accumulation) => compare with loosened tolerance.
    np.testing.assert_allclose(np.asarray(out), np.asarray(ref),
                               rtol=2e-2, atol=2e-2)
    print("KERNEL_OK")
</pallas_src>

<mosaic_0001>
module attributes {stable_mosaic.version = 11 : i64} {
  func.func @_disblock_kernel(%arg0: i32, %arg1: memref<4x256xf32, #tpu.memory_space<vmem>>, %arg2: memref<4x37xbf16, #tpu.memory_space<vmem>>, %arg3: memref<8x37xbf16, #tpu.memory_space<vmem>>, %arg4: memref<8x5xbf16, #tpu.memory_space<vmem>>, %arg5: memref<256x64xbf16, #tpu.memory_space<vmem>>, %arg6: memref<9x256xf32, #tpu.memory_space<vmem>>, %arg7: memref<1x8x64xf32, #tpu.memory_space<vmem>>) attributes {dimension_semantics = [#tpu.dimension_semantics<parallel>], iteration_bounds = array<i64: 2>, scalar_prefetch = 0 : i64, scratch_operands = 0 : i64, tpu.core_type = #tpu.core_type<tc>, window_params = [{transform_indices = @transform_0, window_bounds = array<i64: 4, 256>}, {pipeline_mode = #tpu.pipeline_mode<synchronous>, transform_indices = @transform_1, window_bounds = array<i64: 4, 37>}, {pipeline_mode = #tpu.pipeline_mode<synchronous>, transform_indices = @transform_2, window_bounds = array<i64: 8, 37>}, {pipeline_mode = #tpu.pipeline_mode<synchronous>, transform_indices = @transform_3, window_bounds = array<i64: 8, 5>}, {pipeline_mode = #tpu.pipeline_mode<synchronous>, transform_indices = @transform_4, window_bounds = array<i64: 256, 64>}, {pipeline_mode = #tpu.pipeline_mode<synchronous>, transform_indices = @transform_5, window_bounds = array<i64: 9, 256>}, {transform_indices = @transform_6, window_bounds = array<i64: 1, 8, 64>}]} {
    %c0 = arith.constant 0 : index
    %c0_0 = arith.constant 0 : index
    %0 = vector.load %arg1[%c0, %c0_0] : memref<4x256xf32, #tpu.memory_space<vmem>>, vector<4x256xf32>
    %c0_1 = arith.constant 0 : index
    %c0_2 = arith.constant 0 : index
    %1 = vector.load %arg6[%c0_1, %c0_2] : memref<9x256xf32, #tpu.memory_space<vmem>>, vector<9x256xf32>
    %cst = arith.constant 1.000000e+00 : bf16
    %2 = vector.broadcast %cst : bf16 to vector<1x256xbf16>
    %cst_3 = arith.constant 0.000000e+00 : f32
    %3 = vector.broadcast %cst_3 : f32 to vector<4x256xf32>
    %4 = arith.maximumf %0, %3 : vector<4x256xf32>
    %c0_4 = arith.constant 0 : index
    %c0_5 = arith.constant 0 : index
    %5 = vector.load %arg2[%c0_4, %c0_5] : memref<4x37xbf16, #tpu.memory_space<vmem>>, vector<4x37xbf16>
    %6 = vector.extract_strided_slice %4 {offsets = [0, 239], sizes = [4, 17], strides = [1, 1]} : vector<4x256xf32> to vector<4x17xf32>
    %7 = vector.extract_strided_slice %4 {offsets = [0, 0], sizes = [4, 239], strides = [1, 1]} : vector<4x256xf32> to vector<4x239xf32>
    %8 = tpu.concatenate %6, %7 in 1 : vector<4x17xf32>, vector<4x239xf32> -> vector<4x256xf32>
    %9 = vector.extract_strided_slice %1 {offsets = [0, 0], sizes = [1, 256], strides = [1, 1]} : vector<9x256xf32> to vector<1x256xf32>
    %10 = vector.broadcast %9 : vector<1x256xf32> to vector<4x256xf32>
    %11 = arith.mulf %8, %10 : vector<4x256xf32>
    %12 = arith.truncf %11 : vector<4x256xf32> to vector<4x256xbf16>
    %13 = vector.extract_strided_slice %4 {offsets = [0, 240], sizes = [4, 16], strides = [1, 1]} : vector<4x256xf32> to vector<4x16xf32>
    %14 = vector.extract_strided_slice %4 {offsets = [0, 0], sizes = [4, 240], strides = [1, 1]} : vector<4x256xf32> to vector<4x240xf32>
    %15 = tpu.concatenate %13, %14 in 1 : vector<4x16xf32>, vector<4x240xf32> -> vector<4x256xf32>
    %16 = vector.extract_strided_slice %1 {offsets = [1, 0], sizes = [1, 256], strides = [1, 1]} : vector<9x256xf32> to vector<1x256xf32>
    %17 = vector.broadcast %16 : vector<1x256xf32> to vector<4x256xf32>
    %18 = arith.mulf %15, %17 : vector<4x256xf32>
    %19 = arith.truncf %18 : vector<4x256xf32> to vector<4x256xbf16>
    %20 = vector.extract_strided_slice %4 {offsets = [0, 241], sizes = [4, 15], strides = [1, 1]} : vector<4x256xf32> to vector<4x15xf32>
    %21 = vector.extract_strided_slice %4 {offsets = [0, 0], sizes = [4, 241], strides = [1, 1]} : vector<4x256xf32> to vector<4x241xf32>
    %22 = tpu.concatenate %20, %21 in 1 : vector<4x15xf32>, vector<4x241xf32> -> vector<4x256xf32>
    %23 = vector.extract_strided_slice %1 {offsets = [2, 0], sizes = [1, 256], strides = [1, 1]} : vector<9x256xf32> to vector<1x256xf32>
    %24 = vector.broadcast %23 : vector<1x256xf32> to vector<4x256xf32>
    %25 = arith.mulf %22, %24 : vector<4x256xf32>
    %26 = arith.truncf %25 : vector<4x256xf32> to vector<4x256xbf16>
    %27 = vector.extract_strided_slice %4 {offsets = [0, 255], sizes = [4, 1], strides = [1, 1]} : vector<4x256xf32> to vector<4x1xf32>
    %28 = vector.extract_strided_slice %4 {offsets = [0, 0], sizes = [4, 255], strides = [1, 1]} : vector<4x256xf32> to vector<4x255xf32>
    %29 = tpu.concatenate %27, %28 in 1 : vector<4x1xf32>, vector<4x255xf32> -> vector<4x256xf32>
    %30 = vector.extract_strided_slice %1 {offsets = [3, 0], sizes = [1, 256], strides = [1, 1]} : vector<9x256xf32> to vector<1x256xf32>
    %31 = vector.broadcast %30 : vector<1x256xf32> to vector<4x256xf32>
    %32 = arith.mulf %29, %31 : vector<4x256xf32>
    %33 = arith.truncf %32 : vector<4x256xf32> to vector<4x256xbf16>
    %34 = arith.truncf %4 : vector<4x256xf32> to vector<4x256xbf16>
    %35 = vector.extract_strided_slice %4 {offsets = [0, 1], sizes = [4, 255], strides = [1, 1]} : vector<4x256xf32> to vector<4x255xf32>
    %36 = vector.extract_strided_slice %4 {offsets = [0, 0], sizes = [4, 1], strides = [1, 1]} : vector<4x256xf32> to vector<4x1xf32>
    %37 = tpu.concatenate %35, %36 in 1 : vector<4x255xf32>, vector<4x1xf32> -> vector<4x256xf32>
    %38 = vector.extract_strided_slice %1 {offsets = [5, 0], sizes = [1, 256], strides = [1, 1]} : vector<9x256xf32> to vector<1x256xf32>
    %39 = vector.broadcast %38 : vector<1x256xf32> to vector<4x256xf32>
    %40 = arith.mulf %37, %39 : vector<4x256xf32>
    %41 = arith.truncf %40 : vector<4x256xf32> to vector<4x256xbf16>
    %42 = vector.extract_strided_slice %4 {offsets = [0, 15], sizes = [4, 241], strides = [1, 1]} : vector<4x256xf32> to vector<4x241xf32>
    %43 = vector.extract_strided_slice %4 {offsets = [0, 0], sizes = [4, 15], strides = [1, 1]} : vector<4x256xf32> to vector<4x15xf32>
    %44 = tpu.concatenate %42, %43 in 1 : vector<4x241xf32>, vector<4x15xf32> -> vector<4x256xf32>
    %45 = vector.extract_strided_slice %1 {offsets = [6, 0], sizes = [1, 256], strides = [1, 1]} : vector<9x256xf32> to vector<1x256xf32>
    %46 = vector.broadcast %45 : vector<1x256xf32> to vector<4x256xf32>
    %47 = arith.mulf %44, %46 : vector<4x256xf32>
    %48 = arith.truncf %47 : vector<4x256xf32> to vector<4x256xbf16>
    %49 = vector.extract_strided_slice %4 {offsets = [0, 16], sizes = [4, 240], strides = [1, 1]} : vector<4x256xf32> to vector<4x240xf32>
    %50 = vector.extract_strided_slice %4 {offsets = [0, 0], sizes = [4, 16], strides = [1, 1]} : vector<4x256xf32> to vector<4x16xf32>
    %51 = tpu.concatenate %49, %50 in 1 : vector<4x240xf32>, vector<4x16xf32> -> vector<4x256xf32>
    %52 = vector.extract_strided_slice %1 {offsets = [7, 0], sizes = [1, 256], strides = [1, 1]} : vector<9x256xf32> to vector<1x256xf32>
    %53 = vector.broadcast %52 : vector<1x256xf32> to vector<4x256xf32>
    %54 = arith.mulf %51, %53 : vector<4x256xf32>
    %55 = arith.truncf %54 : vector<4x256xf32> to vector<4x256xbf16>
    %56 = vector.extract_strided_slice %4 {offsets = [0, 17], sizes = [4, 239], strides = [1, 1]} : vector<4x256xf32> to vector<4x239xf32>
    %57 = vector.extract_strided_slice %4 {offsets = [0, 0], sizes = [4, 17], strides = [1, 1]} : vector<4x256xf32> to vector<4x17xf32>
    %58 = tpu.concatenate %56, %57 in 1 : vector<4x239xf32>, vector<4x17xf32> -> vector<4x256xf32>
    %59 = vector.extract_strided_slice %1 {offsets = [8, 0], sizes = [1, 256], strides = [1, 1]} : vector<9x256xf32> to vector<1x256xf32>
    %60 = vector.broadcast %59 : vector<1x256xf32> to vector<4x256xf32>
    %61 = arith.mulf %58, %60 : vector<4x256xf32>
    %62 = arith.truncf %61 : vector<4x256xf32> to vector<4x256xbf16>
    %63 = tpu.concatenate %12, %19, %26, %33, %34, %41, %48, %55, %62, %2 in 0 : vector<4x256xbf16>, vector<4x256xbf16>, vector<4x256xbf16>, vector<4x256xbf16>, vector<4x256xbf16>, vector<4x256xbf16>, vector<4x256xbf16>, vector<4x256xbf16>, vector<4x256xbf16>, vector<1x256xbf16> -> vector<37x256xbf16>
    %cst_6 = arith.constant dense<0.000000e+00> : vector<4x256xf32>
    %64 = tpu.matmul %5, %63, %cst_6 {dimension_numbers = #tpu.dot_dimension_numbers<[1], [0], [0], [1], [0, 0, 1, 1], [], []>} : vector<4x37xbf16>, vector<37x256xbf16>, vector<4x256xf32> -> vector<4x256xf32>
    %cst_7 = arith.constant 0.000000e+00 : f32
    %65 = vector.broadcast %cst_7 : f32 to vector<4x256xf32>
    %66 = arith.maximumf %64, %65 : vector<4x256xf32>
    %c0_8 = arith.constant 0 : index
    %c0_9 = arith.constant 0 : index
    %67 = vector.load %arg3[%c0_8, %c0_9] : memref<8x37xbf16, #tpu.memory_space<vmem>>, vector<8x37xbf16>
    %68 = vector.extract_strided_slice %66 {offsets = [0, 239], sizes = [4, 17], strides = [1, 1]} : vector<4x256xf32> to vector<4x17xf32>
    %69 = vector.extract_strided_slice %66 {offsets = [0, 0], sizes = [4, 239], strides = [1, 1]} : vector<4x256xf32> to vector<4x239xf32>
    %70 = tpu.concatenate %68, %69 in 1 : vector<4x17xf32>, vector<4x239xf32> -> vector<4x256xf32>
    %71 = vector.extract_strided_slice %1 {offsets = [0, 0], sizes = [1, 256], strides = [1, 1]} : vector<9x256xf32> to vector<1x256xf32>
    %72 = vector.broadcast %71 : vector<1x256xf32> to vector<4x256xf32>
    %73 = arith.mulf %70, %72 : vector<4x256xf32>
    %74 = arith.truncf %73 : vector<4x256xf32> to vector<4x256xbf16>
    %75 = vector.extract_strided_slice %66 {offsets = [0, 240], sizes = [4, 16], strides = [1, 1]} : vector<4x256xf32> to vector<4x16xf32>
    %76 = vector.extract_strided_slice %66 {offsets = [0, 0], sizes = [4, 240], strides = [1, 1]} : vector<4x256xf32> to vector<4x240xf32>
    %77 = tpu.concatenate %75, %76 in 1 : vector<4x16xf32>, vector<4x240xf32> -> vector<4x256xf32>
    %78 = vector.extract_strided_slice %1 {offsets = [1, 0], sizes = [1, 256], strides = [1, 1]} : vector<9x256xf32> to vector<1x256xf32>
    %79 = vector.broadcast %78 : vector<1x256xf32> to vector<4x256xf32>
    %80 = arith.mulf %77, %79 : vector<4x256xf32>
    %81 = arith.truncf %80 : vector<4x256xf32> to vector<4x256xbf16>
    %82 = vector.extract_strided_slice %66 {offsets = [0, 241], sizes = [4, 15], strides = [1, 1]} : vector<4x256xf32> to vector<4x15xf32>
    %83 = vector.extract_strided_slice %66 {offsets = [0, 0], sizes = [4, 241], strides = [1, 1]} : vector<4x256xf32> to vector<4x241xf32>
    %84 = tpu.concatenate %82, %83 in 1 : vector<4x15xf32>, vector<4x241xf32> -> vector<4x256xf32>
    %85 = vector.extract_strided_slice %1 {offsets = [2, 0], sizes = [1, 256], strides = [1, 1]} : vector<9x256xf32> to vector<1x256xf32>
    %86 = vector.broadcast %85 : vector<1x256xf32> to vector<4x256xf32>
    %87 = arith.mulf %84, %86 : vector<4x256xf32>
    %88 = arith.truncf %87 : vector<4x256xf32> to vector<4x256xbf16>
    %89 = vector.extract_strided_slice %66 {offsets = [0, 255], sizes = [4, 1], strides = [1, 1]} : vector<4x256xf32> to vector<4x1xf32>
    %90 = vector.extract_strided_slice %66 {offsets = [0, 0], sizes = [4, 255], strides = [1, 1]} : vector<4x256xf32> to vector<4x255xf32>
    %91 = tpu.concatenate %89, %90 in 1 : vector<4x1xf32>, vector<4x255xf32> -> vector<4x256xf32>
    %92 = vector.extract_strided_slice %1 {offsets = [3, 0], sizes = [1, 256], strides = [1, 1]} : vector<9x256xf32> to vector<1x256xf32>
    %93 = vector.broadcast %92 : vector<1x256xf32> to vector<4x256xf32>
    %94 = arith.mulf %91, %93 : vector<4x256xf32>
    %95 = arith.truncf %94 : vector<4x256xf32> to vector<4x256xbf16>
    %96 = arith.truncf %66 : vector<4x256xf32> to vector<4x256xbf16>
    %97 = vector.extract_strided_slice %66 {offsets = [0, 1], sizes = [4, 255], strides = [1, 1]} : vector<4x256xf32> to vector<4x255xf32>
    %98 = vector.extract_strided_slice %66 {offsets = [0, 0], sizes = [4, 1], strides = [1, 1]} : vector<4x256xf32> to vector<4x1xf32>
    %99 = tpu.concatenate %97, %98 in 1 : vector<4x255xf32>, vector<4x1xf32> -> vector<4x256xf32>
    %100 = vector.extract_strided_slice %1 {offsets = [5, 0], sizes = [1, 256], strides = [1, 1]} : vector<9x256xf32> to vector<1x256xf32>
    %101 = vector.broadcast %100 : vector<1x256xf32> to vector<4x256xf32>
    %102 = arith.mulf %99, %101 : vector<4x256xf32>
    %103 = arith.truncf %102 : vector<4x256xf32> to vector<4x256xbf16>
    %104 = vector.extract_strided_slice %66 {offsets = [0, 15], sizes = [4, 241], strides = [1, 1]} : vector<4x256xf32> to vector<4x241xf32>
    %105 = vector.extract_strided_slice %66 {offsets = [0, 0], sizes = [4, 15], strides = [1, 1]} : vector<4x256xf32> to vector<4x15xf32>
    %106 = tpu.concatenate %104, %105 in 1 : vector<4x241xf32>, vector<4x15xf32> -> vector<4x256xf32>
    %107 = vector.extract_strided_slice %1 {offsets = [6, 0], sizes = [1, 256], strides = [1, 1]} : vector<9x256xf32> to vector<1x256xf32>
    %108 = vector.broadcast %107 : vector<1x256xf32> to vector<4x256xf32>
    %109 = arith.mulf %106, %108 : vector<4x256xf32>
    %110 = arith.truncf %109 : vector<4x256xf32> to vector<4x256xbf16>
    %111 = vector.extract_strided_slice %66 {offsets = [0, 16], sizes = [4, 240], strides = [1, 1]} : vector<4x256xf32> to vector<4x240xf32>
    %112 = vector.extract_strided_slice %66 {offsets = [0, 0], sizes = [4, 16], strides = [1, 1]} : vector<4x256xf32> to vector<4x16xf32>
    %113 = tpu.concatenate %111, %112 in 1 : vector<4x240xf32>, vector<4x16xf32> -> vector<4x256xf32>
    %114 = vector.extract_strided_slice %1 {offsets = [7, 0], sizes = [1, 256], strides = [1, 1]} : vector<9x256xf32> to vector<1x256xf32>
    %115 = vector.broadcast %114 : vector<1x256xf32> to vector<4x256xf32>
    %116 = arith.mulf %113, %115 : vector<4x256xf32>
    %117 = arith.truncf %116 : vector<4x256xf32> to vector<4x256xbf16>
    %118 = vector.extract_strided_slice %66 {offsets = [0, 17], sizes = [4, 239], strides = [1, 1]} : vector<4x256xf32> to vector<4x239xf32>
    %119 = vector.extract_strided_slice %66 {offsets = [0, 0], sizes = [4, 17], strides = [1, 1]} : vector<4x256xf32> to vector<4x17xf32>
    %120 = tpu.concatenate %118, %119 in 1 : vector<4x239xf32>, vector<4x17xf32> -> vector<4x256xf32>
    %121 = vector.extract_strided_slice %1 {offsets = [8, 0], sizes = [1, 256], strides = [1, 1]} : vector<9x256xf32> to vector<1x256xf32>
    %122 = vector.broadcast %121 : vector<1x256xf32> to vector<4x256xf32>
    %123 = arith.mulf %120, %122 : vector<4x256xf32>
    %124 = arith.truncf %123 : vector<4x256xf32> to vector<4x256xbf16>
    %125 = tpu.concatenate %74, %81, %88, %95, %96, %103, %110, %117, %124, %2 in 0 : vector<4x256xbf16>, vector<4x256xbf16>, vector<4x256xbf16>, vector<4x256xbf16>, vector<4x256xbf16>, vector<4x256xbf16>, vector<4x256xbf16>, vector<4x256xbf16>, vector<4x256xbf16>, vector<1x256xbf16> -> vector<37x256xbf16>
    %cst_10 = arith.constant dense<0.000000e+00> : vector<8x256xf32>
    %126 = tpu.matmul %67, %125, %cst_10 {dimension_numbers = #tpu.dot_dimension_numbers<[1], [0], [0], [1], [0, 0, 1, 1], [], []>} : vector<8x37xbf16>, vector<37x256xbf16>, vector<8x256xf32> -> vector<8x256xf32>
    %127 = arith.truncf %126 : vector<8x256xf32> to vector<8x256xbf16>
    %128 = arith.truncf %0 : vector<4x256xf32> to vector<4x256xbf16>
    %129 = tpu.concatenate %127, %128, %2 in 0 : vector<8x256xbf16>, vector<4x256xbf16>, vector<1x256xbf16> -> vector<13x256xbf16>
    %c0_11 = arith.constant 0 : index
    %c0_12 = arith.constant 0 : index
    %130 = vector.load %arg5[%c0_11, %c0_12] : memref<256x64xbf16, #tpu.memory_space<vmem>>, vector<256x64xbf16>
    %cst_13 = arith.constant dense<0.000000e+00> : vector<13x64xf32>
    %131 = tpu.matmul %129, %130, %cst_13 {dimension_numbers = #tpu.dot_dimension_numbers<[1], [0], [0], [1], [0, 0, 1, 1], [], []>} : vector<13x256xbf16>, vector<256x64xbf16>, vector<13x64xf32> -> vector<13x64xf32>
    %132 = vector.extract_strided_slice %131 {offsets = [0, 0], sizes = [8, 64], strides = [1, 1]} : vector<13x64xf32> to vector<8x64xf32>
    %c0_14 = arith.constant 0 : index
    %c0_15 = arith.constant 0 : index
    %133 = vector.load %arg4[%c0_14, %c0_15] : memref<8x5xbf16, #tpu.memory_space<vmem>>, vector<8x5xbf16>
    %134 = vector.extract_strided_slice %131 {offsets = [8, 0], sizes = [5, 64], strides = [1, 1]} : vector<13x64xf32> to vector<5x64xf32>
    %135 = arith.truncf %134 : vector<5x64xf32> to vector<5x64xbf16>
    %cst_16 = arith.constant dense<0.000000e+00> : vector<8x64xf32>
    %136 = tpu.matmul %133, %135, %cst_16 {dimension_numbers = #tpu.dot_dimension_numbers<[1], [0], [0], [1], [0, 0, 1, 1], [], []>} : vector<8x5xbf16>, vector<5x64xbf16>, vector<8x64xf32> -> vector<8x64xf32>
    %137 = arith.addf %132, %136 : vector<8x64xf32>
    %c0_17 = arith.constant 0 : index
    %c0_18 = arith.constant 0 : index
    %c0_19 = arith.constant 0 : index
    %138 = vector.load %arg7[%c0_17, %c0_18, %c0_19] : memref<1x8x64xf32, #tpu.memory_space<vmem>>, vector<1x8x64xf32>
    %139 = vector.shape_cast %138 : vector<1x8x64xf32> to vector<8x64xf32>
    %140 = vector.shape_cast %137 : vector<8x64xf32> to vector<1x8x64xf32>
    tpu.vector_store %arg7[%c0_17, %c0_18, %c0_19], %140 {strides = array<i32>} : memref<1x8x64xf32, #tpu.memory_space<vmem>>, vector<1x8x64xf32>,
    return
  }
  func.func @transform_0(%arg0: i32) -> (i32, i32) {
    %c0_i32 = arith.constant 0 : i32
    %c0_i32_0 = arith.constant 0 : i32
    return %c0_i32, %arg0 : i32, i32
  }
  func.func @transform_1(%arg0: i32) -> (i32, i32) {
    %c0_i32 = arith.constant 0 : i32
    %c0_i32_0 = arith.constant 0 : i32
    %c0_i32_1 = arith.constant 0 : i32
    return %c0_i32, %c0_i32_0 : i32, i32
  }
  func.func @transform_2(%arg0: i32) -> (i32, i32) {
    %c0_i32 = arith.constant 0 : i32
    %c0_i32_0 = arith.constant 0 : i32
    %c0_i32_1 = arith.constant 0 : i32
    return %c0_i32, %c0_i32_0 : i32, i32
  }
  func.func @transform_3(%arg0: i32) -> (i32, i32) {
    %c0_i32 = arith.constant 0 : i32
    %c0_i32_0 = arith.constant 0 : i32
    %c0_i32_1 = arith.constant 0 : i32
    return %c0_i32, %c0_i32_0 : i32, i32
  }
  func.func @transform_4(%arg0: i32) -> (i32, i32) {
    %c0_i32 = arith.constant 0 : i32
    %c0_i32_0 = arith.constant 0 : i32
    %c0_i32_1 = arith.constant 0 : i32
    return %c0_i32, %c0_i32_0 : i32, i32
  }
  func.func @transform_5(%arg0: i32) -> (i32, i32) {
    %c0_i32 = arith.constant 0 : i32
    %c0_i32_0 = arith.constant 0 : i32
    %c0_i32_1 = arith.constant 0 : i32
    return %c0_i32, %c0_i32_0 : i32, i32
  }
  func.func @transform_6(%arg0: i32) -> (i32, i32, i32) {
    %c0_i32 = arith.constant 0 : i32
    %c0_i32_0 = arith.constant 0 : i32
    %c0_i32_1 = arith.constant 0 : i32
    return %arg0, %c0_i32, %c0_i32_0 : i32, i32, i32
  }
}

</mosaic_0001>

<bundles_post_ra>
// kernel: tpu_custom_call.1
= control target key start
LH: loop header
LB: loop body
LE: loop exit
PB: predicated region body
PF: predicated region fallthrough
CT: control target
= control target key end

     0   :  { %11 = vsyncpa [#allocation3], 0  ;;  %s1729_s0 = inlined_call_operand.vmem [shape: f32[4,512], index: 0, kind: input, shape index: {}]   ;;  %s1730_s1 = inlined_call_operand.vmem [shape: bf16[4,37], index: 1, kind: input, shape index: {}]   ;;  %s1731_s2 = inlined_call_operand.vmem [shape: bf16[8,37], index: 2, kind: input, shape index: {}]   ;;  %s1732_s3 = inlined_call_operand.vmem [shape: bf16[8,5], index: 3, kind: input, shape index: {}]   ;;  %s1733_s4 = inlined_call_operand.vmem [shape: bf16[256,64], index: 4, kind: input, shape index: {}]   ;;  %s1734_s5 = inlined_call_operand.vmem [shape: f32[9,256], index: 5, kind: input, shape index: {}]   ;;  %s1735_s6 = inlined_call_operand.hbm [shape: f32[2,8,64], index: 6, kind: output, shape index: {}]  }
   0x1   :  { %13 = vsyncpa [#allocation3 + $0x1], 0  ;;  %s1336_s21 = smov 0   ;;  %s1338_s22 = smov 0  }
   0x2   :  { %s1340_s23 = smov 0   ;;  %s1342_s24 = smov 0  }
   0x3 LB: > { %s1357_s25 = sadd.s32 4294967295, %s1290_s24   ;;  %s1082_s26 = sadd.s32 4294967294, %s1290_s24   ;;  %s1290_s24 = sphi %s1342_s24, %s1741_s24   ;;  %s1286_s23 = sphi %s1340_s23, %s1740_s23   ;;  %s1282_s22 = sphi %s1338_s22, %s1739_s22   ;;  %s1278_s21 = sphi %s1336_s21, %s1738_s21  }
   0x4   : > { %s1361_s27 = sadd.s32 1, %s1290_s24   ;;  %s157_s28 = sadd.s32 1, %s1286_s23 }
   0x5   : > { %s154_s29 = ssub.s32 %s1290_s24, %s1361_s27  ;;  %p167_p0 = scmp.ne.s32.totalorder %s1286_s23, %s1282_s22 }
   0x6   : > { %p155_p1 = scmp.eq.s32.totalorder %s154_s29, 0  ;;  %p168_p2 = scmp.eq.s32.totalorder %s1357_s25, 1 }
   0x7   : > { %p173_p3 = scmp.ne.s32.totalorder %s1282_s22, %s1278_s21  ;;  %p174_p4 = scmp.eq.s32.totalorder %s1082_s26, 1 }
   0x8   : > { %s1372_s30 = scalar_select %p155_p1, %s1286_s23, %s157_s28  }
   0x9   : > { %p1374_p5 = por %p168_p2, %p167_p0  ;;  %p1378_p6 = por %p174_p4, %p173_p3 }
   0xa   : > { %p1085_p7 = scmp.ge.s32.totalorder %s1290_s24, 1  ;;  %p216_p8 = scmp.lt.s32.totalorder %s1290_s24, 3 }
   0xc   : > { %p217_p9 = pnand %p1085_p7, %p216_p8 }
   0xd   : > { %s1087_s9 = sshll.u32 (!%p217_p9), %s1357_s25, 1  ;;  %s1292_s14 = smov (!%p217_p9), 17  }
   0xe   : > { %220 = sbr.rel (%p217_p9) target bundleno = 1026 (0x402), region = 44  ;;  %p247_p10 = scmp.lt.s32.totalorder (!%p217_p9), %s1087_s9, 3 }
   0xf   : > { %s1293_s15 = smov (!%p217_p9), 16   ;;  %s1294_s16 = smov (!%p217_p9), 127  }
  0x10   : > { %s1295_s17 = smov (!%p217_p9), 113   ;;  %s1296_s18 = smov (!%p217_p9), 112  }
  0x11   : > { %s1297_s19 = smov (!%p217_p9), 111   ;;  %s1298_s20 = smov (!%p217_p9), 1  }
  0x12   : > { %s1299_s26 = smov (!%p217_p9), 15  }
  0x13   : > { %s1743_s9 = smov (!%p247_p10, %s1087_s9), 3  ;;  %vm363_vm0 = vcmask 1039360   ;;  %v1442_v40 = vld [vmem:[%s1734_s5 + $0x8] sm:$0xff]  ;;  %v1447_v41 = vld [vmem:[%s1734_s5] sm:$0xff]  ;;  %vm407_vm1 = vcmask 916480   ;;  %vm274_vm2 = vcmask 138240  }
  0x14   : > { %s1088_s10 = sshll.u32 %s1743_s9, 2  ;;  %v373_v42 = vperm.slane %v1447_v41, 5  ;;  %v374_v43 = vperm.slane %v1442_v40, 5  ;;  %vm385_vm3 = vcmask 924672   ;;  %v280_v52 = vperm.slane %v1442_v40, 0 }
  0x15   : > { %s250_s13 = scalar_lea.vmem %s1729_s0, %s1088_s10  ;;  %vm296_vm4 = vcmask 130048   ;;  %v417_v53 = vperm.slane %v1447_v41, 7  ;;  %v418_v54 = vperm.slane %v1442_v40, 7  ;;  %v395_v56 = vperm.slane %v1447_v41, 6 }
  0x16   : > { %v1388_v0 = vld [vmem:[%s250_s13] sm:$0xff]  ;;  %v396_v57 = vperm.slane %v1442_v40, 6  ;;  %v279_v60 = vperm.slane %v1447_v41, 0  ;;  %vm429_vm5 = vcmask 908288   ;;  %vm497_vm6 = vcmask 1041408  }
  0x17   : > { %v1391_v1 = vmax.f32 %v1388_v0, 0.0  ;;  %vm541_vm7 = vcmask 1042432   ;;  %vm340_vm8 = vcmask 7168   ;;  %vm504_vm9 = vcmask 1043456  }
  0x18   : > { %vm509_vm10 = vcmask 1045504   ;;  %vm318_vm11 = vcmask 121856   ;;  %vm537_vm12 = vcmask 302080   ;;  %vm984_vm13 = vcmask 39936  }
  0x19   : > { %262 = vst [vmem:[#allocation1] ss:$2 sm:$0xff] %v1391_v1  ;;  %vm1005_vm14 = vcmask 523264  }
  0x20   : > { %v263_v2 = vld.sshfl [vmem:[#allocation1 + $0x8] sm:$0xff pattern:$0x75316420] }
  0x21   : > { %267 = vst [vmem:[#allocation1] ss:$2 sm:$0xff] %v1391_v1  ;;  %264 = vrot.lane.b32.xlu0 %v263_v2, %s1292_s14 }
  0x28   : > { %v268_v3 = vld.sshfl [vmem:[#allocation1] sm:$0xff pattern:$0x75316420]  ;;  %v269_v4 = vld.sshfl [vmem:[#allocation1 + $0x8] sm:$0xff pattern:$0x75316420] }
  0x29   : > { %270 = vrot.lane.b32.xlu1 %v268_v3, %s1292_s14  ;;  %284 = vst [vmem:[#allocation1] ss:$2 sm:$0xff] %v1391_v1  ;;  %272 = vrot.lane.b32.xlu2 %v269_v4, %s1292_s14 }
  0x30   : > { %v285_v5 = vld.sshfl [vmem:[#allocation1 + $0x8] sm:$0xff pattern:$0x75316420] }
  0x31   : > { %289 = vst [vmem:[#allocation1] ss:$2 sm:$0xff] %v1391_v1  ;;  %286 = vrot.lane.b32.xlu0 %v285_v5, %s1293_s15  ;;  %v301_v5 = vperm.slane %v1447_v41, 1 }
  0x38   : > { %v290_v6 = vld.sshfl [vmem:[#allocation1] sm:$0xff pattern:$0x75316420]  ;;  %v291_v7 = vld.sshfl [vmem:[#allocation1 + $0x8] sm:$0xff pattern:$0x75316420] }
  0x39   : > { %292 = vrot.lane.b32.xlu1 %v290_v6, %s1293_s15  ;;  %306 = vst [vmem:[#allocation1] ss:$2 sm:$0xff] %v1391_v1  ;;  %294 = vrot.lane.b32.xlu2 %v291_v7, %s1293_s15 }
  0x40   : > { %v307_v8 = vld.sshfl [vmem:[#allocation1 + $0x8] sm:$0xff pattern:$0x75316420] }
  0x41   : > { %311 = vst [vmem:[#allocation1] ss:$2 sm:$0xff] %v1391_v1 }
  0x48   : > { %v312_v9 = vld.sshfl [vmem:[#allocation1] sm:$0xff pattern:$0x75316420]  ;;  %v313_v10 = vld.sshfl [vmem:[#allocation1 + $0x8] sm:$0xff pattern:$0x75316420] }
  0x49   : > { %328 = vst [vmem:[#allocation1] ss:$2 sm:$0xff] %v1391_v1 }
  0x50   : > { %v329_v11 = vld.sshfl [vmem:[#allocation1 + $0x8] sm:$0xff pattern:$0x75316420] }
  0x51   : > { %333 = vst [vmem:[#allocation1] ss:$2 sm:$0xff] %v1391_v1 }
  0x58   : > { %v334_v12 = vld.sshfl [vmem:[#allocation1] sm:$0xff pattern:$0x75316420]  ;;  %v335_v13 = vld.sshfl [vmem:[#allocation1 + $0x8] sm:$0xff pattern:$0x75316420] }
  0x59   : > { %350 = vst [vmem:[#allocation1] ss:$2 sm:$0xff] %v1391_v1 }
  0x60   : > { %v1408_v14 = vld.sshfl [vmem:[#allocation1] sm:$0xff pattern:$0x75316420]  ;;  %v1410_v15 = vld.sshfl [vmem:[#allocation1 + $0x8] sm:$0xff pattern:$0x75316420] }
  0x61   : > { %356 = vst [vmem:[#allocation1] ss:$2 sm:$0xff] %v1391_v1  ;;  %v355_v63 = vpack.c.bf16 %v1410_v15, %v1408_v14 }
  0x63   : > { %v469_v14 = vunpack.c.l.b16 %v355_v63 }
  0x68   : > { %v357_v16 = vld.sshfl [vmem:[#allocation1] sm:$0xff pattern:$0x75316420]  ;;  %v358_v17 = vld.sshfl [vmem:[#allocation1 + $0x8] sm:$0xff pattern:$0x75316420] }
  0x69   : > { %359 = vrot.lane.b32.xlu1 %v357_v16, %s1294_s16  ;;  %367 = vst [vmem:[#allocation1] ss:$2 sm:$0xff] %v1391_v1  ;;  %361 = vrot.lane.b32.xlu2 %v358_v17, %s1294_s16 }
  0x70   : > { %v368_v18 = vld.sshfl [vmem:[#allocation1] sm:$0xff pattern:$0x75316420] }
  0x71   : > { %378 = vst [vmem:[#allocation1] ss:$2 sm:$0xff] %v1391_v1  ;;  %369 = vrot.lane.b32.xlu2 %v368_v18, %s1294_s16  ;;  %v470_v18 = vunpack.c.h.b16 %v355_v63 }
  0x78   : > { %v380_v19 = vld.sshfl [vmem:[#allocation1 + $0x8] sm:$0xff pattern:$0x75316420]  ;;  %v379_v20 = vld.sshfl [vmem:[#allocation1] sm:$0xff pattern:$0x75316420] }
  0x79   : > { %383 = vrot.lane.b32.xlu1 %v380_v19, %s1295_s17  ;;  %381 = vrot.lane.b32.xlu0 %v379_v20, %s1295_s17  ;;  %389 = vst [vmem:[#allocation1] ss:$2 sm:$0xff] %v1391_v1 }
  0x80   : > { %v390_v21 = vld.sshfl [vmem:[#allocation1] sm:$0xff pattern:$0x75316420] }
  0x81   : > { %400 = vst [vmem:[#allocation1] ss:$2 sm:$0xff] %v1391_v1  ;;  %391 = vrot.lane.b32.xlu2 %v390_v21, %s1295_s17 }
  0x83   : > { %v273_v28 = vpop.permute.xlu2 %272 }
  0x88   : > { %v402_v22 = vld.sshfl [vmem:[#allocation1 + $0x8] sm:$0xff pattern:$0x75316420]  ;;  %v401_v23 = vld.sshfl [vmem:[#allocation1] sm:$0xff pattern:$0x75316420] }
  0x89   : > { %405 = vrot.lane.b32.xlu1 %v402_v22, %s1296_s18  ;;  %403 = vrot.lane.b32.xlu0 %v401_v23, %s1296_s18  ;;  %411 = vst [vmem:[#allocation1] ss:$2 sm:$0xff] %v1391_v1 }
  0x90   : > { %v412_v24 = vld.sshfl [vmem:[#allocation1] sm:$0xff pattern:$0x75316420] }
  0x91   : > { %422 = vst [vmem:[#allocation1] ss:$2 sm:$0xff] %v1391_v1  ;;  %413 = vrot.lane.b32.xlu2 %v412_v24, %s1296_s18 }
  0x93   : > { %v295_v30 = vpop.permute.xlu2 %294  ;;  %v265_v31 = vpop.permute.xlu0 %264 }
  0x98   : > { %v423_v25 = vld.sshfl [vmem:[#allocation1] sm:$0xff pattern:$0x75316420]  ;;  %v424_v26 = vld.sshfl [vmem:[#allocation1 + $0x8] sm:$0xff pattern:$0x75316420] }
  0x99   : > { %425 = vrot.lane.b32.xlu0 %v423_v25, %s1297_s19  ;;  %433 = vst [vmem:[#allocation1] ss:$2 sm:$0xff] %v1391_v1  ;;  %338 = vrot.lane.b32.xlu2 %v335_v13, %s1298_s20  ;;  %v302_v1 = vperm.slane %v1442_v40, 1  ;;  %v1491_v13 = vld [vmem:[%s1734_s5 + $0x18] ss:$0 sm:$0xff] }
  0x9b   : > { %v271_v29 = vpop.permute.xlu1 %270 }
  0x9c   : > { %v278_v4 = vsel %vm274_vm2, %v265_v31, %v271_v29 }
  0x9d   : > { %v281_v19 = vmul.f32 %v279_v60, %v278_v4 }
  0xa0   : > { %v434_v27 = vld.sshfl [vmem:[#allocation1] sm:$0xff pattern:$0x75316420] }
  0xa1   : > { %427 = vrot.lane.b32.xlu0 %v424_v26, %s1297_s19  ;;  %435 = vrot.lane.b32.xlu1 %v434_v27, %s1297_s19  ;;  %800 = vst [vmem:[#allocation1] ss:$2 sm:$0xff] %v1388_v0  ;;  %v275_v0 = vsel %vm274_vm2, %v271_v29, %v273_v28 }
  0xa2   : > { %316 = vrot.lane.b32.xlu2 %v313_v10, %s1299_s26  ;;  %v282_v15 = vmul.f32 %v280_v52, %v275_v0 }
  0xa3   : > { %v287_v34 = vpop.permute.xlu0 %286 }
  0xa9   : > { %330 = vrot.lane.b32.xlu0 %v329_v11, %s1298_s20  ;;  %336 = vrot.lane.b32.xlu1 %v334_v12, %s1298_s20  ;;  %v1486_v12 = vld [vmem:[%s1734_s5 + $0x10] ss:$0 sm:$0xff] }
  0xab   : > { %v293_v32 = vpop.permute.xlu1 %292 }
  0xb1   : > { %308 = vrot.lane.b32.xlu0 %v307_v8, %s1299_s26  ;;  %314 = vrot.lane.b32.xlu1 %v312_v9, %s1299_s26  ;;  %v297_v8 = vsel %vm296_vm4, %v293_v32, %v295_v30  ;;  %v300_v9 = vsel %vm296_vm4, %v287_v34, %v293_v32  ;;  %v471_v30 = vpack.c.b16 %v469_v14, %v469_v14 }
  0xb2   : > { %v304_v20 = vmul.f32 %v302_v1, %v297_v8  ;;  %v303_v21 = vmul.f32 %v301_v5, %v300_v9  ;;  %v283_v14 = vpack.c.bf16 %v282_v15, %v281_v19  ;;  %v323_v15 = vperm.slane %v1447_v41, 2 }
  0xb3   : > { %v324_v19 = vperm.slane %v1442_v40, 2 }
  0xc3   : > { %v362_v33 = vpop.permute.xlu2 %361 }
  0xcb   : > { %v370_v36 = vpop.permute.xlu2 %369 }
  0xcc   : > { %v372_v45 = vsel %vm363_vm0, %v362_v33, %v370_v36  ;;  %v1300_v36 = vmov 65535  }
  0xcd   : > { %v376_v48 = vmul.f32 %v374_v43, %v372_v45 }
  0xdb   : > { %v360_v35 = vpop.permute.xlu1 %359  ;;  %v392_v39 = vpop.permute.xlu2 %391 }
  0xdc   : > { %v364_v44 = vsel %vm363_vm0, %v360_v35, %v362_v33  ;;  %v472_v33 = vpack.c.b16 %v470_v18, %v470_v18 }
  0xdd   : > { %v375_v47 = vmul.f32 %v373_v42, %v364_v44  ;;  %v305_v44 = vpack.c.bf16 %v304_v20, %v303_v21 }
  0xdf   : > { %v377_v51 = vpack.c.bf16 %v376_v48, %v375_v47  ;;  %v345_v47 = vperm.slane %v1447_v41, 3  ;;  %v346_v48 = vperm.slane %v1442_v40, 3  ;;  %v450_v18 = vunpack.c.l.b16 %v305_v44 }
  0xe0   : > { %v451_v20 = vunpack.c.h.b16 %v305_v44 }
  0xe1   : > { %v474_v2 = vunpack.c.l.b16 %v377_v51  ;;  %v475_v3 = vunpack.c.h.b16 %v377_v51 }
  0xe3   : > { %v476_v16 = vpack.c.b16 %v474_v2, %v474_v2  ;;  %v477_v17 = vpack.c.b16 %v475_v3, %v475_v3 }
  0xe5   : > { %v478_v31 = vrot.slane %v476_v16, 6  ;;  %v479_v32 = vrot.slane %v477_v17, 6 }
  0xeb   : > { %v382_v37 = vpop.permute.xlu0 %381  ;;  %v384_v38 = vpop.permute.xlu1 %383 }
  0xec   : > { %v414_v50 = vpop.permute.xlu2 %413  ;;  %v386_v61 = vsel %vm385_vm3, %v382_v37, %v384_v38  ;;  %v394_v62 = vsel %vm385_vm3, %v384_v38, %v392_v39  ;;  %v542_v37 = vsel %vm497_vm6, 4294967295, %v1300_v36 }
  0xed   : > { %v397_v10 = vmul.f32 %v395_v56, %v386_v61  ;;  %v398_v11 = vmul.f32 %v396_v57, %v394_v62  ;;  %v1509_v51 = vsel %vm541_vm7, %v542_v37, 0 }
  0xef   : > { %v399_v25 = vpack.c.bf16 %v398_v11, %v397_v10 }
  0xf1   : > { %v481_v45 = vunpack.c.l.b16 %v399_v25 }
  0xf4   : > { %v339_v35 = vpop.permute.xlu2 %338 }
  0xfb   : > { %v404_v46 = vpop.permute.xlu0 %403  ;;  %v406_v49 = vpop.permute.xlu1 %405 }
  0xfc   : > { %v408_v58 = vsel %vm407_vm1, %v404_v46, %v406_v49  ;;  %v416_v59 = vsel %vm407_vm1, %v406_v49, %v414_v50  ;;  %v482_v46 = vunpack.c.h.b16 %v399_v25 }
  0xfd   : > { %v419_v6 = vmul.f32 %v417_v53, %v408_v58  ;;  %v420_v7 = vmul.f32 %v418_v54, %v416_v59  ;;  %v521_v58 = vsel %vm497_vm6, %v472_v33, %v479_v32 }
  0xff   : > { %v421_v22 = vpack.c.bf16 %v420_v7, %v419_v6  ;;  %v483_v6 = vpack.c.b16 %v481_v45, %v481_v45  ;;  %v484_v7 = vpack.c.b16 %v482_v46, %v482_v46 }
 0x101   : > { %v486_v38 = vunpack.c.l.b16 %v421_v22  ;;  %v487_v39 = vunpack.c.h.b16 %v421_v22  ;;  %v525_v25 = vsel %vm504_vm9, %v521_v58, %v484_v7 }
 0x103   : > { %v488_v0 = vpack.c.b16 %v486_v38, %v486_v38  ;;  %v489_v2 = vpack.c.b16 %v487_v39, %v487_v39 }
 0x105   : > { %v490_v21 = vrot.slane %v488_v0, 2  ;;  %v491_v22 = vrot.slane %v489_v2, 2 }
 0x10b   : > { %v426_v55 = vpop.permute.xlu0 %425 }
 0x113   : > { %v428_v23 = vpop.permute.xlu0 %427  ;;  %v436_v24 = vpop.permute.xlu1 %435 }
 0x114   : > { %v430_v26 = vsel %vm429_vm5, %v426_v55, %v428_v23  ;;  %v438_v27 = vsel %vm429_vm5, %v428_v23, %v436_v24  ;;  %v518_v55 = vsel %vm497_vm6, %v471_v30, %v478_v31  ;;  %v453_v30 = vpack.c.b16 %v451_v20, %v451_v20 }
 0x115   : > { %v441_v28 = vmul.f32 %v1486_v12, %v430_v26  ;;  %v442_v29 = vmul.f32 %v1491_v13, %v438_v27  ;;  %v523_v24 = vsel %vm504_vm9, %v518_v55, %v483_v6  ;;  %v317_v26 = vpop.permute.xlu2 %316  ;;  %v445_v27 = vunpack.c.l.b16 %v283_v14 }
 0x116   : > { %v527_v33 = vsel %vm509_vm10, %v523_v24, %v490_v21  ;;  %v455_v55 = vrot.slane %v453_v30, 6 }
 0x117   : > { %v443_v34 = vpack.c.bf16 %v442_v29, %v441_v28  ;;  %v446_v28 = vunpack.c.h.b16 %v283_v14  ;;  %v452_v29 = vpack.c.b16 %v450_v18, %v450_v18  ;;  %v447_v45 = vpack.c.b16 %v445_v27, %v445_v27 }
 0x119   : > { %v493_v49 = vunpack.c.l.b16 %v443_v34  ;;  %v494_v50 = vunpack.c.h.b16 %v443_v34  ;;  %v530_v34 = vsel %vm509_vm10, %v525_v25, %v491_v22  ;;  %v448_v46 = vpack.c.b16 %v446_v28, %v446_v28 }
 0x11b   : > { %v331_v59 = vpop.permute.xlu0 %330  ;;  %v337_v61 = vpop.permute.xlu1 %336  ;;  %v495_v62 = vpack.c.b16 %v493_v49, %v493_v49  ;;  %v496_v63 = vpack.c.b16 %v494_v50, %v494_v50  ;;  %v454_v50 = vrot.slane %v452_v29, 6  ;;  %v503_v6 = vsel %vm497_vm6, %v448_v46, %v455_v55 }
 0x11c   : > { %v341_v3 = vsel %vm340_vm8, %v337_v61, %v339_v35  ;;  %v344_v4 = vsel %vm340_vm8, %v331_v59, %v337_v61 }
 0x11d   : > { %v347_v8 = vmul.f32 %v345_v47, %v344_v4  ;;  %v348_v9 = vmul.f32 %v346_v48, %v341_v3  ;;  %v534_v10 = vsel %vm497_vm6, %v495_v62, 1065369472  ;;  %v536_v11 = vsel %vm497_vm6, %v496_v63, 1065369472 }
 0x11e   : > { %v544_v16 = vand.u32 %v1509_v51, %v534_v10  ;;  %v546_v17 = vand.u32 %v1509_v51, %v536_v11  ;;  %v500_v3 = vsel %vm497_vm6, %v447_v45, %v454_v50  ;;  %v260_v11 = vld [vmem:[%s1730_s1] sm:$0x3] }
 0x11f   : > { %v349_v23 = vpack.c.bf16 %v348_v9, %v347_v8 }
 0x120   : > { %553 = vmatpush.bf16.msra.mxu3 %v544_v16  ;;  %566 = vmatpush.bf16.msra.mxu1 %v546_v17 }
 0x121   : > { %v462_v37 = vunpack.c.l.b16 %v349_v23  ;;  %v463_v38 = vunpack.c.h.b16 %v349_v23 }
 0x123   : > { %v309_v31 = vpop.permute.xlu0 %308  ;;  %v315_v32 = vpop.permute.xlu1 %314  ;;  %v464_v58 = vpack.c.b16 %v462_v37, %v462_v37  ;;  %v465_v59 = vpack.c.b16 %v463_v38, %v463_v38 }
 0x124   : > { %v319_v35 = vsel %vm318_vm11, %v315_v32, %v317_v26  ;;  %v322_v36 = vsel %vm318_vm11, %v309_v31, %v315_v32  ;;  %554 = vmatpush.bf16.msra.mxu3 %v527_v33  ;;  %567 = vmatpush.bf16.msra.mxu1 %v530_v34 }
 0x125   : > { %v325_v39 = vmul.f32 %v323_v15, %v322_v36  ;;  %v326_v44 = vmul.f32 %v324_v19, %v319_v35  ;;  %v466_v2 = vrot.slane %v464_v58, 2  ;;  %v467_v4 = vrot.slane %v465_v59, 2  ;;  %v1177_v59 = vld [vmem:[%s1733_s4 + $0x78] sm:$0xff] }
 0x127   : > { %v327_v49 = vpack.c.bf16 %v326_v44, %v325_v39 }
 0x129   : > { %v457_v61 = vunpack.c.l.b16 %v327_v49  ;;  %v458_v62 = vunpack.c.h.b16 %v327_v49 }
 0x12b   : > { %v459_v63 = vpack.c.b16 %v457_v61, %v457_v61  ;;  %v460_v0 = vpack.c.b16 %v458_v62, %v458_v62 }
 0x12d   : > { %v506_v7 = vsel %vm504_vm9, %v500_v3, %v459_v63  ;;  %v508_v8 = vsel %vm504_vm9, %v503_v6, %v460_v0 }
 0x12e   : > { %v511_v9 = vsel %vm509_vm10, %v506_v7, %v466_v2  ;;  %v514_v10 = vsel %vm509_vm10, %v508_v8, %v467_v4  ;;  %v1168_v7 = vld [vmem:[%s1733_s4 + $0x30] sm:$0xff] }
 0x12f   : > { %555 = vmatpush.bf16.msra.mxu3 %v511_v9  ;;  %568 = vmatpush.bf16.msra.mxu1 %v514_v10 }
 0x132   : > { %1089 = vmatmul.msk.bf16.vlgmr.msra.gmra.mxu3 %vm537_vm12, %v260_v11  ;;  %1090 = vmatmul.msk.bf16.vlgmr.msra.gmra.mxu1 %vm537_vm12, %v260_v11 }
 0x133   : > { %968 = vmatpush.bf16.msrb.mxu1 %v1177_v59 }
 0x1af   : > { %v570_v14 = vpop.f32.mrf.mxu1 }
 0x1b0   : > { %v575_v16 = vmax.f32 %v570_v14, 0.0 }
 0x1b2   : > { %654 = vrot.lane.b32.xlu2 %v575_v16, %s1296_s18  ;;  %630 = vrot.lane.b32.xlu0 %v575_v16, %s1294_s16 }
 0x1b3   : > { %666 = vrot.lane.b32.xlu1 %v575_v16, %s1297_s19 }
 0x1b5   : > { %v557_v17 = vpop.f32.mrf.mxu3 }
 0x1b6   : > { %v574_v18 = vmax.f32 %v557_v17, 0.0 }
 0x1b7   : > { %v572_v20 = vpop.f32.mrf.mxu1 }
 0x1b8   : > { %v1549_v21 = vpack.c.bf16 %v575_v16, %v574_v18  ;;  %v1176_v20 = vld [vmem:[%s1733_s4 + $0x70] sm:$0xff] }
 0x1b9   : > { %969 = vmatpush.bf16.msrb.mxu1 %v1176_v20 }
 0x1ba   : > { %591 = vrot.lane.b32.xlu2 %v575_v16, %s1293_s15  ;;  %615 = vrot.lane.b32.xlu0 %v575_v16, %s1298_s20 }
 0x1bb   : > { %642 = vrot.lane.b32.xlu1 %v575_v16, %s1295_s17 }
 0x1bd   : > { %v559_v22 = vpop.f32.mrf.mxu3 }
 0x1c2   : > { %628 = vrot.lane.b32.xlu2 %v574_v18, %s1294_s16  ;;  %664 = vrot.lane.b32.xlu0 %v574_v18, %s1297_s19 }
 0x1c3   : > { %578 = vrot.lane.b32.xlu1 %v575_v16, %s1292_s14 }
 0x1ca   : > { %582 = vrot.lane.b32.xlu2 %v574_v18, %s1292_s14  ;;  %640 = vrot.lane.b32.xlu0 %v574_v18, %s1295_s17 }
 0x1cb   : > { %652 = vrot.lane.b32.xlu1 %v574_v18, %s1296_s18  ;;  %s1248_s18 = scalar_lea.hbm %s1735_s6, 16 }
 0x1d2   : > { %603 = vrot.lane.b32.xlu2 %v575_v16, %s1299_s26  ;;  %594 = vrot.lane.b32.xlu0 %v574_v18, %s1293_s15 }
 0x1d3   : > { %618 = vrot.lane.b32.xlu1 %v574_v18, %s1298_s20  ;;  %s243_s20 = sand.u32 1, %s1282_s22  }
 0x1d4   : > { %s1086_s10 = sshll.u32 %s243_s20, 3  ;;  %s1008_s14 = scalar_lea.sflag [#allocation3], %s243_s20 }
 0x1d5   : > { %s245_s28 = scalar_lea.vmem [#allocation2], %s1086_s10 }
 0x1d6   : > { %s1020_s29 = sshll.u32 %s245_s28, 4  ;;  %s1021_s29 = int_to_ptr.vmem [resolvable:$true] %s1020_s29 }
 0x1da   : > { %606 = vrot.lane.b32.xlu0 %v574_v18, %s1299_s26  ;;  %s1159_s26 = sshll.u32 %s1357_s25, 3 }
 0x1db   : > { %s1018_s13 = scalar_lea.hbm %s1735_s6, %s1159_s26 }
 0x1dc   : > { %s1022_s9 = sshll.u32 %s1018_s13, 4  ;;  %s1023_s9 = int_to_ptr.hbm [resolvable:$true] %s1022_s9 }
 0x1dd   : > { %s1242_s15 = sshra.s32 %s1023_s9, 4  ;;  %s1243_s15 = int_to_ptr.hbm [resolvable:$true] %s1242_s15 }
 0x1de   : > { %s1244_s16 = scalar_lea.hbm %s1243_s15, 8  ;;  %p1249_p0 = scmp.lt.s32.totalorder %s1243_s15, %s1735_s6 }
 0x1df   : > { %p1245_p11 = scmp.ne.s32.totalorder %s1243_s15, %s1244_s16  ;;  %p1250_p1 = scmp.lt.s32.totalorder %s1248_s18, %s1244_s16 }
 0x1e1   : > { %p1246_p12 = pnand %p1245_p11, %p1374_p5  ;;  %p1251_p2 = por %p1250_p1, %p1249_p0 }
 0x1e3   : > { %p1247_p13 = pneg %p1246_p12 }
 0x1e5   : > { %p1252_p3 = pnand %p1251_p2, %p1247_p13 }
 0x20c   : > { %v655_v23 = vpop.permute.xlu2 %654 }
 0x214   : > { %v1564_v24 = vpop.permute.xlu2 %591 }
 0x21c   : > { %v629_v27 = vpop.permute.xlu2 %628 }
 0x224   : > { %v631_v25 = vpop.permute.xlu0 %630 }
 0x225   : > { %v667_v26 = vpop.permute.xlu1 %666  ;;  %v632_v28 = vsel %vm363_vm0, %v629_v27, %v631_v25  ;;  %v636_v29 = vsel %vm363_vm0, %v631_v25, %v629_v27  ;;  %v1167_v27 = vld [vmem:[%s1733_s4 + $0x28] sm:$0xff] }
 0x226   : > { %v637_v31 = vmul.f32 %v632_v28, %v373_v42  ;;  %v638_v32 = vmul.f32 %v636_v29, %v374_v43  ;;  %v1169_v43 = vld [vmem:[%s1733_s4 + $0x38] sm:$0xff] }
 0x227   : > { %954 = vmatpush.bf16.msra.mxu0 %v1169_v43 }
 0x228   : > { %v639_v34 = vpack.c.bf16 %v638_v32, %v637_v31 }
 0x22a   : > { %v706_v36 = vunpack.c.l.b16 %v639_v34  ;;  %v707_v37 = vunpack.c.h.b16 %v639_v34 }
 0x22b   : > { %955 = vmatpush.bf16.msra.mxu0 %v1168_v7 }
 0x22c   : > { %v1568_v30 = vpop.permute.xlu0 %615  ;;  %v708_v50 = vpack.c.b16 %v706_v36, %v706_v36  ;;  %v709_v42 = vpack.c.b16 %v707_v37, %v707_v37 }
 0x22d   : > { %v643_v33 = vpop.permute.xlu1 %642 }
 0x22e   : > { %v710_v0 = vrot.slane %v708_v50, 6  ;;  %v711_v2 = vrot.slane %v709_v42, 6 }
 0x22f   : > { %956 = vmatpush.bf16.msra.mxu0 %v1167_v27 }
 0x234   : > { %v665_v35 = vpop.permute.xlu0 %664 }
 0x235   : > { %v579_v38 = vpop.permute.xlu1 %578  ;;  %v668_v39 = vsel %vm429_vm5, %v665_v35, %v667_v26  ;;  %v672_v44 = vsel %vm429_vm5, %v667_v26, %v665_v35  ;;  %v1175_v35 = vld [vmem:[%s1733_s4 + $0x68] sm:$0xff] }
 0x236   : > { %v673_v45 = vmul.f32 %v1486_v12, %v668_v39  ;;  %v674_v46 = vmul.f32 %v1491_v13, %v672_v44  ;;  %v701_v12 = vunpack.c.l.b16 %v1549_v21  ;;  %v702_v13 = vunpack.c.h.b16 %v1549_v21  ;;  %v583_v21 = vpop.permute.xlu2 %582  ;;  %970 = vmatpush.bf16.msrb.mxu1 %v1175_v35 }
 0x237   : > { %v587_v25 = vsel %vm274_vm2, %v579_v38, %v583_v21 }
 0x238   : > { %v675_v49 = vpack.c.bf16 %v674_v46, %v673_v45  ;;  %v704_v26 = vpack.c.b16 %v702_v13, %v702_v13  ;;  %v588_v36 = vmul.f32 %v587_v25, %v279_v60  ;;  %v1166_v60 = vld [vmem:[%s1733_s4 + $0x20] sm:$0xff] }
 0x239   : > { %957 = vmatpush.bf16.msra.mxu0 %v1166_v60 }
 0x23a   : > { %v725_v55 = vunpack.c.l.b16 %v675_v49  ;;  %v726_v58 = vunpack.c.h.b16 %v675_v49  ;;  %v750_v34 = vsel %vm497_vm6, %v704_v26, %v711_v2 }
 0x23c   : > { %v641_v61 = vpop.permute.xlu0 %640  ;;  %v727_v62 = vpack.c.b16 %v725_v55, %v725_v55  ;;  %v728_v63 = vpack.c.b16 %v726_v58, %v726_v58 }
 0x23d   : > { %v653_v3 = vpop.permute.xlu1 %652  ;;  %v644_v4 = vsel %vm385_vm3, %v641_v61, %v643_v33  ;;  %v648_v6 = vsel %vm385_vm3, %v643_v33, %v641_v61 }
 0x23e   : > { %v656_v8 = vsel %vm407_vm1, %v653_v3, %v655_v23  ;;  %v660_v9 = vsel %vm407_vm1, %v655_v23, %v653_v3  ;;  %v649_v10 = vmul.f32 %v644_v4, %v395_v56  ;;  %v650_v11 = vmul.f32 %v648_v6, %v396_v57  ;;  %v1173_v4 = vld [vmem:[%s1733_s4 + $0x58] sm:$0xff]  ;;  %v604_v6 = vpop.permute.xlu2 %603 }
 0x23f   : > { %v661_v14 = vmul.f32 %v656_v8, %v417_v53  ;;  %v662_v16 = vmul.f32 %v660_v9, %v418_v54  ;;  %v762_v17 = vsel %vm497_vm6, %v727_v62, 1065369472  ;;  %v764_v18 = vsel %vm497_vm6, %v728_v63, 1065369472 }
 0x240   : > { %v651_v56 = vpack.c.bf16 %v650_v11, %v649_v10  ;;  %v768_v22 = vand.u32 %v762_v17, %v1509_v51  ;;  %v770_v57 = vand.u32 %v764_v18, %v1509_v51  ;;  %v703_v23 = vpack.c.b16 %v701_v12, %v701_v12  ;;  %v1164_v17 = vld [vmem:[%s1733_s4 + $0x10] sm:$0xff] }
 0x241   : > { %v584_v53 = vsel %vm274_vm2, %v583_v21, %v579_v38  ;;  %v663_v54 = vpack.c.bf16 %v662_v16, %v661_v14 }
 0x242   : > { %v713_v28 = vunpack.c.l.b16 %v651_v56  ;;  %v714_v29 = vunpack.c.h.b16 %v651_v56  ;;  %777 = vmatpush.bf16.msra.mxu2 %v768_v22  ;;  %790 = vmatpush.bf16.msrb.mxu3 %v770_v57  ;;  %v747_v32 = vsel %vm497_vm6, %v703_v23, %v710_v0  ;;  %v589_v37 = vmul.f32 %v584_v53, %v280_v52  ;;  %v1172_v22 = vld [vmem:[%s1733_s4 + $0x50] sm:$0xff] }
 0x243   : > { %v718_v31 = vunpack.c.l.b16 %v663_v54  ;;  %v719_v33 = vunpack.c.h.b16 %v663_v54 }
 0x244   : > { %v595_v38 = vpop.permute.xlu0 %594  ;;  %v715_v39 = vpack.c.b16 %v713_v28, %v713_v28  ;;  %v716_v44 = vpack.c.b16 %v714_v29, %v714_v29  ;;  %v590_v3 = vpack.c.bf16 %v589_v37, %v588_v36  ;;  %v576_v37 = vld [vmem:[%s1731_s2] sm:$0xf] }
 0x245   : > { %v619_v45 = vpop.permute.xlu1 %618  ;;  %v596_v46 = vsel %vm296_vm4, %v595_v38, %v1564_v24  ;;  %v599_v49 = vsel %vm296_vm4, %v1564_v24, %v595_v38  ;;  %v720_v50 = vpack.c.b16 %v718_v31, %v718_v31  ;;  %v721_v42 = vpack.c.b16 %v719_v33, %v719_v33  ;;  %v1163_v38 = vld [vmem:[%s1733_s4 + $0x8] sm:$0xff] }
 0x246   : > { %v620_v52 = vsel %vm340_vm8, %v619_v45, %v1568_v30  ;;  %v623_v55 = vsel %vm340_vm8, %v1568_v30, %v619_v45  ;;  %v600_v58 = vmul.f32 %v599_v49, %v301_v5  ;;  %v601_v43 = vmul.f32 %v596_v46, %v302_v1  ;;  %v1174_v30 = vld [vmem:[%s1733_s4 + $0x60] sm:$0xff]  ;;  %v802_v49 = vld.sshfl [vmem:[#allocation1 + $0x8] sm:$0xff pattern:$0x75316420] }
 0x247   : > { %v624_v24 = vmul.f32 %v623_v55, %v345_v47  ;;  %v625_v59 = vmul.f32 %v620_v52, %v346_v48  ;;  %v722_v61 = vrot.slane %v720_v50, 2  ;;  %v752_v62 = vsel %vm504_vm9, %v747_v32, %v715_v39  ;;  %v1165_v47 = vld [vmem:[%s1733_s4 + $0x18] sm:$0xff]  ;;  %971 = vmatpush.bf16.msrb.mxu1 %v1174_v30  ;;  %v1171_v39 = vld [vmem:[%s1733_s4 + $0x48] sm:$0xff]  ;;  %v1170_v45 = vld [vmem:[%s1733_s4 + $0x40] sm:$0xff] }
 0x248   : > { %v602_v63 = vpack.c.bf16 %v601_v43, %v600_v58  ;;  %v723_v12 = vrot.slane %v721_v42, 2  ;;  %v754_v5 = vsel %vm504_vm9, %v750_v34, %v716_v44  ;;  %958 = vmatpush.bf16.msra.mxu0 %v1165_v47  ;;  %v677_v21 = vunpack.c.l.b16 %v590_v3  ;;  %v1162_v44 = vld [vmem:[%s1733_s4] sm:$0xff] }
 0x249   : > { %v626_v13 = vpack.c.bf16 %v625_v59, %v624_v24  ;;  %v756_v1 = vsel %vm509_vm10, %v752_v62, %v722_v61  ;;  %v678_v56 = vunpack.c.h.b16 %v590_v3  ;;  %v801_v46 = vld.sshfl [vmem:[#allocation1] sm:$0xff pattern:$0x75316420] }
 0x24a   : > { %v682_v48 = vunpack.c.l.b16 %v602_v63  ;;  %v683_v0 = vunpack.c.h.b16 %v602_v63  ;;  %778 = vmatpush.bf16.msra.mxu2 %v756_v1  ;;  %v759_v2 = vsel %vm509_vm10, %v754_v5, %v723_v12  ;;  %v679_v41 = vpack.c.b16 %v677_v21, %v677_v21 }
 0x24b   : > { %791 = vmatpush.bf16.msrb.mxu3 %v759_v2  ;;  %v694_v8 = vunpack.c.l.b16 %v626_v13  ;;  %v695_v9 = vunpack.c.h.b16 %v626_v13  ;;  %972 = vmatpush.bf16.msrb.mxu1 %v1173_v4  ;;  %v805_v50 = vpack.c.bf16 %v802_v49, %v801_v46 }
 0x24c   : > { %v607_v7 = vpop.permute.xlu0 %606  ;;  %v684_v10 = vpack.c.b16 %v682_v48, %v682_v48  ;;  %v685_v11 = vpack.c.b16 %v683_v0, %v683_v0  ;;  %959 = vmatpush.bf16.msra.mxu0 %v1164_v17 }
 0x24d   : > { %v608_v14 = vsel %vm318_vm11, %v607_v7, %v604_v6  ;;  %v611_v16 = vsel %vm318_vm11, %v604_v6, %v607_v7  ;;  %v696_v25 = vpack.c.b16 %v694_v8, %v694_v8  ;;  %v697_v54 = vpack.c.b16 %v695_v9, %v695_v9  ;;  %v982_v9 = vld [vmem:[%s1732_s3] sm:$0xf] }
 0x24e   : > { %v612_v18 = vmul.f32 %v611_v16, %v323_v15  ;;  %v613_v20 = vmul.f32 %v608_v14, %v324_v19  ;;  %v686_v23 = vrot.slane %v684_v10, 6  ;;  %v687_v53 = vrot.slane %v685_v11, 6 }
 0x24f   : > { %v680_v15 = vpack.c.b16 %v678_v56, %v678_v56  ;;  %973 = vmatpush.bf16.msrb.mxu1 %v1172_v22  ;;  %v698_v28 = vrot.slane %v696_v25, 2  ;;  %v699_v31 = vrot.slane %v697_v54, 2  ;;  %v812_v42 = vunpack.c.l.b16 %v805_v50 }
 0x250   : > { %v614_v57 = vpack.c.bf16 %v613_v20, %v612_v18  ;;  %v731_v29 = vsel %vm497_vm6, %v679_v41, %v686_v23  ;;  %960 = vmatpush.bf16.msra.mxu0 %v1163_v38  ;;  %v813_v60 = vunpack.c.h.b16 %v805_v50 }
 0x251   : > { %v734_v32 = vsel %vm497_vm6, %v680_v15, %v687_v53  ;;  %v814_v59 = vpack.c.b16 %v812_v42, %v812_v42 }
 0x252   : > { %v689_v26 = vunpack.c.l.b16 %v614_v57  ;;  %v690_v27 = vunpack.c.h.b16 %v614_v57  ;;  %v815_v61 = vpack.c.b16 %v813_v60, %v813_v60 }
 0x253   : > { %974 = vmatpush.bf16.msrb.mxu1 %v1171_v39 }
 0x254   : > { %v691_v40 = vpack.c.b16 %v689_v26, %v689_v26  ;;  %v692_v19 = vpack.c.b16 %v690_v27, %v690_v27  ;;  %961 = vmatpush.bf16.msra.mxu0 %v1162_v44 }
 0x256   : > { %v736_v33 = vsel %vm504_vm9, %v731_v29, %v691_v40  ;;  %v738_v34 = vsel %vm504_vm9, %v734_v32, %v692_v19 }
 0x257   : > { %v740_v35 = vsel %vm509_vm10, %v736_v33, %v698_v28  ;;  %v743_v36 = vsel %vm509_vm10, %v738_v34, %v699_v31  ;;  %975 = vmatpush.bf16.msrb.mxu1 %v1170_v45 }
 0x258   : > { %779 = vmatpush.bf16.msra.mxu2 %v740_v35  ;;  %792 = vmatpush.bf16.msrb.mxu3 %v743_v36 }
 0x25b   : > { %1091 = vmatmul.msk.bf16.vlgmr.msra.gmra.mxu2 %vm537_vm12, %v576_v37  ;;  %1092 = vmatmul.msk.bf16.vlgmr.msrb.gmra.mxu3 %vm537_vm12, %v576_v37 }
 0x2de   : > { %v781_v52 = vpop.f32.mrf.mxu2  ;;  %v794_v55 = vpop.f32.mrf.mxu3 }
 0x2df   : > { %v798_v58 = vpack.c.bf16 %v794_v55, %v781_v52 }
 0x2e1   : > { %v807_v43 = vunpack.c.l.b16 %v798_v58  ;;  %v808_v24 = vunpack.c.h.b16 %v798_v58 }
 0x2e3   : > { %v809_v62 = vpack.c.b16 %v807_v43, %v807_v43  ;;  %v810_v30 = vpack.c.b16 %v808_v24, %v808_v24 }
 0x2e5   : > { %v818_v63 = vsel %vm504_vm9, %v809_v62, %v814_v59  ;;  %v821_v12 = vsel %vm504_vm9, %v810_v30, %v815_v61 }
 0x2e6   : > { %v783_v5 = vpop.f32.mrf.mxu2  ;;  %v796_v13 = vpop.f32.mrf.mxu3  ;;  %v822_v1 = vsel %vm509_vm10, %v818_v63, 1065369472  ;;  %v824_v47 = vsel %vm509_vm10, %v821_v12, 1065369472 }
 0x2e7   : > { %962 = vmatmul.bf16.vlgmr.msra.gmra.mxu0 %v822_v1  ;;  %976 = vmatmul.bf16.vlgmr.msrb.gmra.mxu1 %v824_v47 }
 0x364   : > { %v963_v48 = vpop.f32.mrf.mxu0  ;;  %v977_v0 = vpop.f32.mrf.mxu1 }
 0x365   : > { %v978_v2 = vadd.f32 %v977_v0, %v963_v48 }
 0x36c   : > { %v965_v3 = vpop.f32.mrf.mxu0  ;;  %v979_v4 = vpop.f32.mrf.mxu1 }
 0x36d   : > { %v980_v6 = vadd.f32 %v979_v4, %v965_v3 }
 0x36f   : > { %v983_v7 = vpack.c.bf16 %v980_v6, %v980_v6 }
 0x371   : > { %v989_v8 = vand.u32 %v983_v7, %v1509_v51 }
 0x373   : > { %998 = vmatpush.bf16.msrb.mxu2 %v989_v8 }
 0x376   : > { %1157 = vmatmul.msk.bf16.vlgmr.msrb.gmra.mxu2 %vm984_vm13, %v982_v9 }
 0x3f9   : > { %v1000_v10 = vpop.f32.mrf.mxu2 }
 0x3fa   : > { %v1004_v51 = vadd.f32 %v1000_v10, %v978_v2 }
 0x3fc   : > { %1006 = vst.msk [vmem:[%s245_s28] sm:$0xff] %vm1005_vm14, %v1004_v51 }
 0x3fd   : > { %1255 = shalt.err (!%p1252_p3)
}
 0x3fe   : > { %1178 = dma.vmem_to_hbm [thread:$0]  (%p1374_p5), %s1021_s29, 128, %s1023_s9, %s1008_s14  }
 0x401   : > { %v1002_v11 = vpop.f32.mrf.mxu2 }
 0x402 PF: > { %p1184_p4 = scmp.ge.s32.totalorder %s1290_s24, 2  ;;  %s1034_s20 = sand.u32 1, %s1278_s21  }
 0x403   : > { %s1035_s10 = scalar_lea.sflag [#allocation3], %s1034_s20 }
 0x404   : > { %p1181_p7 = pnand %p1184_p4, %p1378_p6 }
 0x406   : > { %p1182_p8 = pneg %p1181_p7 }
 0x408   : > { %1273 = dma.done.wait (%p1182_p8), %s1035_s10, 128  }
 0x409   : > { %1275 = vsyncadd (%p1182_p8), %s1035_s10, 4294967168  ;;  %p16_p9 = scmp.ge.s32.totalorder %s1361_s27, 4   ;;  %s1738_s21 = smov %s1282_s22 }
 0x40a   : > { %s1739_s22 = smov %s1286_s23  ;;  %s1740_s23 = smov %s1372_s30 }
 0x40b   : > { %s1741_s24 = smov %s1361_s27  ;;  %18 = sbr.rel (!%p16_p9) target bundleno = 3 (0x3), region = 79 }
 0x410   :  { %1041 = vsyncpa [#allocation3], 1 }
 0x411   :  { %1043 = vsyncpa [#allocation3 + $0x1], 1 }

</bundles_post_ra>
